<compile_context>
chip_gen: v7x
topology: tpu7x:2x2x1
jax: 0.10.0
libtpu: 0.0.40
codegen_flags: <defaults>
</compile_context>

<pallas_src>
import functools

import jax
import jax.numpy as jnp
from jax import lax
from jax.experimental import pallas as pl
from jax.experimental.pallas import tpu as pltpu

LANE = 128
SUBLANE = 8
MAX_TILE_ROWS = 8192      # (8192, 128) f32 block = 4 MiB per input
CHUNK_ROWS = 1024         # in-kernel row chunk -> bounds elementwise temporaries


def _cdiv(a, b):
    return -(-a // b)


def _num_tensorcores():
    """2 only on v7x-class (2 TensorCores/chip); 1 on v5e/v6e (single TC)."""
    try:
        kind = jax.devices()[0].device_kind.lower()
    except Exception:
        return 1
    if "v7" in kind or "tpu7" in kind:
        return 2
    return 1


def _prep(x):
    """Flatten to (rows, 128) in the native dtype.

    Zero-copy whenever numel % 128 == 0 (reshape is a bitcast). Only when the
    element count is not a multiple of 128 do we pad (with zeros) so the 2-D
    lane-major reshape is possible; pad elements are masked out in-kernel.
    """
    flat = x.reshape(-1)
    n = int(flat.shape[0])
    pad = (-n) % LANE
    if pad:
        # TODO(synk): numel % 128 != 0 still pays one whole-array pad copy; a
        # fully copy-free ragged path would need a manual-DMA 1-D kernel.
        flat = jnp.pad(flat, (0, pad))
    return flat.reshape(-1, LANE), n


def _tiling(rows):
    if rows <= SUBLANE or rows % SUBLANE == 0:
        tile_rows = min(MAX_TILE_ROWS, rows)          # full dim or multiple of 8
    else:
        tile_rows = min(MAX_TILE_ROWS, (rows // SUBLANE) * SUBLANE)
    nb_total = _cdiv(rows, tile_rows)
    splits = _num_tensorcores()
    if nb_total < splits:
        splits = 1
    nb_per_core = _cdiv(nb_total, splits)
    return tile_rows, nb_total, splits, nb_per_core


def _row_chunk(tile_rows):
    if tile_rows >= CHUNK_ROWS and tile_rows % CHUNK_ROWS == 0:
        return CHUNK_ROWS
    return tile_rows


def _accum_tile(acc_ref, sq, chunk_rows):
    """Accumulate a (chunk_rows, 128) block of squares into an (8, 128) acc."""
    if chunk_rows % SUBLANE == 0:
        acc_ref[...] += jnp.sum(sq.reshape(-1, SUBLANE, LANE), axis=0)
    else:
        # Only reachable for tiny inputs (rows < 8): partial-sublane RMW.
        acc_ref[0:chunk_rows, :] += sq


def _valid_mask(row0, chunk_rows, n_elems):
    """Elementwise `flat index < n_elems` without forming a 32-bit flat index."""
    full_rows = n_elems // LANE
    tail = n_elems % LANE
    row = row0 + lax.broadcasted_iota(jnp.int32, (chunk_rows, LANE), 0)
    valid = row < full_rows
    if tail:
        col = lax.broadcasted_iota(jnp.int32, (chunk_rows, LANE), 1)
        valid = valid | ((row == full_rows) & (col < tail))
    return valid


def _fused_kernel(fake_ref, real_ref, disc_ref, gen_ref, acc_d, acc_g, *,
                  real_label, fake_label, n_elems, tile_rows, nb_per_core,
                  nb_total, use_mask):
    j = pl.program_id(1)

    @pl.when(j == 0)
    def _init():
        acc_d[...] = jnp.zeros_like(acc_d)
        acc_g[...] = jnp.zeros_like(acc_g)

    blk = pl.program_id(0) * nb_per_core + j          # logical (unclamped) block
    chunk_rows = _row_chunk(tile_rows)
    n_chunks = tile_rows // chunk_rows

    def accumulate(masked):
        for ci in range(n_chunks):
            r0 = ci * chunk_rows
            f = fake_ref[pl.ds(r0, chunk_rows), :].astype(jnp.float32)
            r = real_ref[pl.ds(r0, chunk_rows), :].astype(jnp.float32)
            df = f if real_label == 0.0 else f - real_label   # MSE(fake, real_label)
            dr = r - fake_label                               # MSE(real, fake_label)
            dg = f if fake_label == 0.0 else f - fake_label   # MSE(fake, fake_label)
            if masked:
                valid = _valid_mask(blk * tile_rows + r0, chunk_rows, n_elems)
                df = jnp.where(valid, df, 0.0)
                dr = jnp.where(valid, dr, 0.0)
                dg = jnp.where(valid, dg, 0.0)
            _accum_tile(acc_d, df * df + dr * dr, chunk_rows)
            _accum_tile(acc_g, dg * dg, chunk_rows)

    if use_mask:
        last = nb_total - 1

        @pl.when(blk < last)
        def _body():
            accumulate(False)

        @pl.when(blk >= last)          # last valid block + any clamped duplicates
        def _tail():
            accumulate(True)
    else:
        accumulate(False)

    @pl.when(j == pl.num_programs(1) - 1)
    def _fin():
        scale = 0.5 / n_elems          # (sum_f + sum_r)/(2N) ; 0.5*sum_g/N
        disc_ref[...] = jnp.sum(acc_d[...], keepdims=True) * scale
        gen_ref[...] = jnp.sum(acc_g[...], keepdims=True) * scale


def _gen_kernel(fake_ref, gen_ref, acc_g, *, fake_label, n_elems, tile_rows,
                nb_per_core, nb_total, use_mask):
    j = pl.program_id(1)

    @pl.when(j == 0)
    def _init():
        acc_g[...] = jnp.zeros_like(acc_g)

    blk = pl.program_id(0) * nb_per_core + j
    chunk_rows = _row_chunk(tile_rows)
    n_chunks = tile_rows // chunk_rows

    def accumulate(masked):
        for ci in range(n_chunks):
            r0 = ci * chunk_rows
            f = fake_ref[pl.ds(r0, chunk_rows), :].astype(jnp.float32)
            dg = f if fake_label == 0.0 else f - fake_label
            if masked:
                valid = _valid_mask(blk * tile_rows + r0, chunk_rows, n_elems)
                dg = jnp.where(valid, dg, 0.0)
            _accum_tile(acc_g, dg * dg, chunk_rows)

    if use_mask:
        last = nb_total - 1

        @pl.when(blk < last)
        def _body():
            accumulate(False)

        @pl.when(blk >= last)
        def _tail():
            accumulate(True)
    else:
        accumulate(False)

    @pl.when(j == pl.num_programs(1) - 1)
    def _fin():
        gen_ref[...] = jnp.sum(acc_g[...], keepdims=True) * (0.5 / n_elems)


def _specs(tile_rows, nb_total, nb_per_core, n_inputs):
    def in_idx(c, j):
        # Clamp so a fully-out-of-range block (odd split) re-reads the last valid
        # block; its contribution is zeroed by the in-kernel tail mask.
        return (jnp.minimum(c * nb_per_core + j, nb_total - 1), 0)

    def out_idx(c, j):
        return (c, 0)

    in_specs = [pl.BlockSpec((tile_rows, LANE), in_idx) for _ in range(n_inputs)]
    out_spec = pl.BlockSpec((1, 1), out_idx)
    return in_specs, out_spec


def _vmem_limit(input_block_bytes):
    # double-buffered input blocks + generous headroom for chunk temporaries,
    # tiny accumulators and output buffers; capped well under v7x's 64 MiB.
    need = 2 * input_block_bytes + (8 << 20)
    return int(min(max(need, 32 << 20), 60 << 20))


def lsgan_fused_losses(fake, real, *, real_label=0.0, fake_label=1.0):
    """Single streaming pass over fake & real -> (discriminator_loss, generator_loss)."""
    fake2d, n_f = _prep(fake)
    real2d, n_r = _prep(real)
    assert n_f == n_r, "fake and real must have the same number of elements"
    rows = fake2d.shape[0]
    tile_rows, nb_total, splits, nb_per_core = _tiling(rows)
    use_mask = (splits * nb_per_core * tile_rows * LANE) != n_f

    in_specs, out_spec = _specs(tile_rows, nb_total, nb_per_core, 2)
    kernel = functools.partial(
        _fused_kernel, real_label=float(real_label), fake_label=float(fake_label),
        n_elems=n_f, tile_rows=tile_rows, nb_per_core=nb_per_core,
        nb_total=nb_total, use_mask=use_mask)

    blk_bytes = tile_rows * LANE * (fake2d.dtype.itemsize + real2d.dtype.itemsize)
    dims = ("parallel", "arbitrary") if splits > 1 else ("arbitrary", "arbitrary")

    disc_p, gen_p = pl.pallas_call(
        kernel,
        out_shape=(jax.ShapeDtypeStruct((splits, 1), jnp.float32),
                   jax.ShapeDtypeStruct((splits, 1), jnp.float32)),
        grid_spec=pltpu.PrefetchScalarGridSpec(
            num_scalar_prefetch=0,
            grid=(splits, nb_per_core),
            in_specs=in_specs,
            out_specs=(out_spec, out_spec),
            scratch_shapes=[pltpu.VMEM((SUBLANE, LANE), jnp.float32),
                            pltpu.VMEM((SUBLANE, LANE), jnp.float32)]),
        compiler_params=pltpu.CompilerParams(
            dimension_semantics=dims,
            vmem_limit_bytes=_vmem_limit(blk_bytes)),
    )(fake2d, real2d)
    # Combine per-core partial (already-scaled) sums.
    return jnp.sum(disc_p), jnp.sum(gen_p)


def lsgan_generator_loss(fake, *, fake_label=1.0):
    fake2d, n = _prep(fake)
    rows = fake2d.shape[0]
    tile_rows, nb_total, splits, nb_per_core = _tiling(rows)
    use_mask = (splits * nb_per_core * tile_rows * LANE) != n

    in_specs, out_spec = _specs(tile_rows, nb_total, nb_per_core, 1)
    kernel = functools.partial(
        _gen_kernel, fake_label=float(fake_label), n_elems=n,
        tile_rows=tile_rows, nb_per_core=nb_per_core, nb_total=nb_total,
        use_mask=use_mask)

    blk_bytes = tile_rows * LANE * fake2d.dtype.itemsize
    dims = ("parallel", "arbitrary") if splits > 1 else ("arbitrary", "arbitrary")

    gen_p = pl.pallas_call(
        kernel,
        out_shape=jax.ShapeDtypeStruct((splits, 1), jnp.float32),
        grid_spec=pltpu.PrefetchScalarGridSpec(
            num_scalar_prefetch=0,
            grid=(splits, nb_per_core),
            in_specs=in_specs,
            out_specs=out_spec,
            scratch_shapes=[pltpu.VMEM((SUBLANE, LANE), jnp.float32)]),
        compiler_params=pltpu.CompilerParams(
            dimension_semantics=dims,
            vmem_limit_bytes=_vmem_limit(blk_bytes)),
    )(fake2d)
    return jnp.sum(gen_p)


class LsganLossPallas:
    """Mirrors the PyTorch LsganLoss forward (hard labels, use_soft_labels=False)."""

    def __init__(self, use_soft_labels=False):
        # TODO(synk): generate_soft_labels (per-call Uniform-sampled labels) is not
        # wired into the kernel launch; labels stay at deterministic defaults (0 / 1).
        self.use_soft_labels = use_soft_labels
        self.fake_label = 1.0
        self.real_label = 0.0

    def __call__(self, fake, real, is_generator=False):
        if is_generator:
            return lsgan_generator_loss(fake, fake_label=self.fake_label)
        disc, _ = lsgan_fused_losses(fake, real, real_label=self.real_label,
                                     fake_label=self.fake_label)
        return disc

    def both(self, fake, real):
        """Fused single pass: (discriminator_loss, generator_loss) — saves one
        full HBM read of `fake` when both losses are needed in the same step."""
        return lsgan_fused_losses(fake, real, real_label=self.real_label,
                                  fake_label=self.fake_label)


if __name__ == "__main__":
    key = jax.random.PRNGKey(0)
    k1, k2, k3, k4 = jax.random.split(key, 4)

    loss_fn = LsganLossPallas()

    # Case 1: tile-aligned NCHW-like discriminator maps (2*4*16*16 = 16*128 elems).
    fake = jax.random.normal(k1, (2, 4, 16, 16), dtype=jnp.float32)
    real = jax.random.normal(k2, (2, 4, 16, 16), dtype=jnp.float32)

    disc = jax.block_until_ready(loss_fn(fake, real, is_generator=False))
    gen = jax.block_until_ready(loss_fn(fake, real, is_generator=True))
    disc_f, gen_f = loss_fn.both(fake, real)
    jax.block_until_ready((disc_f, gen_f))

    disc_ref = (jnp.mean((fake - 0.0) ** 2) + jnp.mean((real - 1.0) ** 2)) / 2.0
    gen_ref = 0.5 * jnp.mean((fake - 1.0) ** 2)
    assert jnp.allclose(disc, disc_ref, rtol=1e-5, atol=1e-6), (disc, disc_ref)
    assert jnp.allclose(gen, gen_ref, rtol=1e-5, atol=1e-6), (gen, gen_ref)
    assert jnp.allclose(disc_f, disc_ref, rtol=1e-5, atol=1e-6), (disc_f, disc_ref)
    assert jnp.allclose(gen_f, gen_ref, rtol=1e-5, atol=1e-6), (gen_f, gen_ref)

    # Case 2: ragged shape exercising the in-kernel tail mask (1530 elems).
    fake2 = jax.random.normal(k3, (2, 3, 15, 17), dtype=jnp.float32)
    real2 = jax.random.normal(k4, (2, 3, 15, 17), dtype=jnp.float32)
    disc2 = jax.block_until_ready(loss_fn(fake2, real2, is_generator=False))
    gen2 = jax.block_until_ready(loss_fn(fake2, real2, is_generator=True))
    disc2_ref = (jnp.mean((fake2 - 0.0) ** 2) + jnp.mean((real2 - 1.0) ** 2)) / 2.0
    gen2_ref = 0.5 * jnp.mean((fake2 - 1.0) ** 2)
    assert jnp.allclose(disc2, disc2_ref, rtol=1e-5, atol=1e-6), (disc2, disc2_ref)
    assert jnp.allclose(gen2, gen2_ref, rtol=1e-5, atol=1e-6), (gen2, gen2_ref)

    # Case 3: multi-block zero-copy path (128*128 elems = 128 rows, numel % 128 == 0).
    fake3 = jax.random.normal(k1, (8, 4, 32, 16), dtype=jnp.float32)
    real3 = jax.random.normal(k2, (8, 4, 32, 16), dtype=jnp.float32)
    disc3, gen3 = loss_fn.both(fake3, real3)
    jax.block_until_ready((disc3, gen3))
    disc3_ref = (jnp.mean((fake3 - 0.0) ** 2) + jnp.mean((real3 - 1.0) ** 2)) / 2.0
    gen3_ref = 0.5 * jnp.mean((fake3 - 1.0) ** 2)
    assert jnp.allclose(disc3, disc3_ref, rtol=1e-5, atol=1e-6), (disc3, disc3_ref)
    assert jnp.allclose(gen3, gen3_ref, rtol=1e-5, atol=1e-6), (gen3, gen3_ref)

    print("KERNEL_OK")
</pallas_src>

<mosaic_0001>
module attributes {stable_mosaic.version = 11 : i64} {
  func.func @_fused_kernel(%arg0: i32, %arg1: i32, %arg2: memref<16x128xf32, #tpu.memory_space<vmem>>, %arg3: memref<16x128xf32, #tpu.memory_space<vmem>>, %arg4: memref<1x1xf32, #tpu.memory_space<vmem>>, %arg5: memref<1x1xf32, #tpu.memory_space<vmem>>, %arg6: memref<8x128xf32, #tpu.memory_space<vmem>>, %arg7: memref<8x128xf32, #tpu.memory_space<vmem>>) attributes {dimension_semantics = [#tpu.dimension_semantics<arbitrary>, #tpu.dimension_semantics<arbitrary>], iteration_bounds = array<i64: 1, 1>, scalar_prefetch = 0 : i64, scratch_operands = 2 : i64, tpu.core_type = #tpu.core_type<tc>, window_params = [{transform_indices = @transform_0, window_bounds = array<i64: 16, 128>}, {transform_indices = @transform_1, window_bounds = array<i64: 16, 128>}, {transform_indices = @transform_2, window_bounds = array<i64: 1, 1>}, {transform_indices = @transform_3, window_bounds = array<i64: 1, 1>}]} {
    %c0_i32 = arith.constant 0 : i32
    %0 = arith.cmpi eq, %arg1, %c0_i32 : i32
    %1 = arith.extui %0 : i1 to i32
    %c0_i32_0 = arith.constant 0 : i32
    %2 = arith.cmpi ne, %1, %c0_i32_0 : i32
    scf.if %2 {
      %cst_17 = arith.constant 0.000000e+00 : f32
      %26 = vector.broadcast %cst_17 : f32 to vector<8x128xf32>
      %c0_18 = arith.constant 0 : index
      %c0_19 = arith.constant 0 : index
      %27 = vector.load %arg6[%c0_18, %c0_19] : memref<8x128xf32, #tpu.memory_space<vmem>>, vector<8x128xf32>
      tpu.vector_store %arg6[%c0_18, %c0_19], %26 {strides = array<i32>} : memref<8x128xf32, #tpu.memory_space<vmem>>, vector<8x128xf32>,
      %cst_20 = arith.constant 0.000000e+00 : f32
      %28 = vector.broadcast %cst_20 : f32 to vector<8x128xf32>
      %c0_21 = arith.constant 0 : index
      %c0_22 = arith.constant 0 : index
      %29 = vector.load %arg7[%c0_21, %c0_22] : memref<8x128xf32, #tpu.memory_space<vmem>>, vector<8x128xf32>
      tpu.vector_store %arg7[%c0_21, %c0_22], %28 {strides = array<i32>} : memref<8x128xf32, #tpu.memory_space<vmem>>, vector<8x128xf32>,
    } else {
    }
    %c0 = arith.constant 0 : index
    %c0_1 = arith.constant 0 : index
    %3 = vector.load %arg2[%c0, %c0_1] : memref<16x128xf32, #tpu.memory_space<vmem>>, vector<16x128xf32>
    %c0_2 = arith.constant 0 : index
    %c0_3 = arith.constant 0 : index
    %4 = vector.load %arg3[%c0_2, %c0_3] : memref<16x128xf32, #tpu.memory_space<vmem>>, vector<16x128xf32>
    %cst = arith.constant 1.000000e+00 : f32
    %5 = vector.broadcast %cst : f32 to vector<16x128xf32>
    %6 = arith.subf %4, %5 : vector<16x128xf32>
    %cst_4 = arith.constant 1.000000e+00 : f32
    %7 = vector.broadcast %cst_4 : f32 to vector<16x128xf32>
    %8 = arith.subf %3, %7 : vector<16x128xf32>
    %9 = arith.mulf %3, %3 : vector<16x128xf32>
    %10 = arith.mulf %6, %6 : vector<16x128xf32>
    %11 = arith.addf %9, %10 : vector<16x128xf32>
    %c0_5 = arith.constant 0 : index
    %c0_6 = arith.constant 0 : index
    %12 = vector.load %arg6[%c0_5, %c0_6] : memref<8x128xf32, #tpu.memory_space<vmem>>, vector<8x128xf32>
    %13 = vector.shape_cast %11 : vector<16x128xf32> to vector<2x8x128xf32>
    %cst_7 = arith.constant dense<0.000000e+00> : vector<8x128xf32>
    %14 = vector.multi_reduction <add>, %13, %cst_7 [0] : vector<2x8x128xf32> to vector<8x128xf32>
    %15 = arith.addf %12, %14 : vector<8x128xf32>
    %c0_8 = arith.constant 0 : index
    %c0_9 = arith.constant 0 : index
    %16 = vector.load %arg6[%c0_8, %c0_9] : memref<8x128xf32, #tpu.memory_space<vmem>>, vector<8x128xf32>
    tpu.vector_store %arg6[%c0_8, %c0_9], %15 {strides = array<i32>} : memref<8x128xf32, #tpu.memory_space<vmem>>, vector<8x128xf32>,
    %17 = arith.mulf %8, %8 : vector<16x128xf32>
    %c0_10 = arith.constant 0 : index
    %c0_11 = arith.constant 0 : index
    %18 = vector.load %arg7[%c0_10, %c0_11] : memref<8x128xf32, #tpu.memory_space<vmem>>, vector<8x128xf32>
    %19 = vector.shape_cast %17 : vector<16x128xf32> to vector<2x8x128xf32>
    %cst_12 = arith.constant dense<0.000000e+00> : vector<8x128xf32>
    %20 = vector.multi_reduction <add>, %19, %cst_12 [0] : vector<2x8x128xf32> to vector<8x128xf32>
    %21 = arith.addf %18, %20 : vector<8x128xf32>
    %c0_13 = arith.constant 0 : index
    %c0_14 = arith.constant 0 : index
    %22 = vector.load %arg7[%c0_13, %c0_14] : memref<8x128xf32, #tpu.memory_space<vmem>>, vector<8x128xf32>
    tpu.vector_store %arg7[%c0_13, %c0_14], %21 {strides = array<i32>} : memref<8x128xf32, #tpu.memory_space<vmem>>, vector<8x128xf32>,
    %c0_i32_15 = arith.constant 0 : i32
    %23 = arith.cmpi eq, %arg1, %c0_i32_15 : i32
    %24 = arith.extui %23 : i1 to i32
    %c0_i32_16 = arith.constant 0 : i32
    %25 = arith.cmpi ne, %24, %c0_i32_16 : i32
    scf.if %25 {
      %c0_17 = arith.constant 0 : index
      %c0_18 = arith.constant 0 : index
      %26 = vector.load %arg6[%c0_17, %c0_18] : memref<8x128xf32, #tpu.memory_space<vmem>>, vector<8x128xf32>
      %27 = vector.shape_cast %26 : vector<8x128xf32> to vector<1x8x128xf32>
      %cst_19 = arith.constant dense<0.000000e+00> : vector<1xf32>
      %28 = vector.multi_reduction <add>, %27, %cst_19 [1, 2] : vector<1x8x128xf32> to vector<1xf32>
      %29 = vector.shape_cast %28 : vector<1xf32> to vector<1x1x1xf32>
      %30 = vector.extract %29[0, 0, 0] : f32 from vector<1x1x1xf32>
      %31 = vector.broadcast %30 : f32 to vector<1x1xf32>
      %cst_20 = arith.constant 2.44140625E-4 : f32
      %32 = vector.broadcast %cst_20 : f32 to vector<1x1xf32>
      %33 = arith.mulf %31, %32 : vector<1x1xf32>
      %c0_21 = arith.constant 0 : index
      %c0_22 = arith.constant 0 : index
      %34 = vector.load %arg4[%c0_21, %c0_22] : memref<1x1xf32, #tpu.memory_space<vmem>>, vector<1x1xf32>
      tpu.vector_store %arg4[%c0_21, %c0_22], %33 {strides = array<i32>} : memref<1x1xf32, #tpu.memory_space<vmem>>, vector<1x1xf32>,
      %c0_23 = arith.constant 0 : index
      %c0_24 = arith.constant 0 : index
      %35 = vector.load %arg7[%c0_23, %c0_24] : memref<8x128xf32, #tpu.memory_space<vmem>>, vector<8x128xf32>
      %36 = vector.shape_cast %35 : vector<8x128xf32> to vector<1x8x128xf32>
      %cst_25 = arith.constant dense<0.000000e+00> : vector<1xf32>
      %37 = vector.multi_reduction <add>, %36, %cst_25 [1, 2] : vector<1x8x128xf32> to vector<1xf32>
      %38 = vector.shape_cast %37 : vector<1xf32> to vector<1x1x1xf32>
      %39 = vector.extract %38[0, 0, 0] : f32 from vector<1x1x1xf32>
      %40 = vector.broadcast %39 : f32 to vector<1x1xf32>
      %cst_26 = arith.constant 2.44140625E-4 : f32
      %41 = vector.broadcast %cst_26 : f32 to vector<1x1xf32>
      %42 = arith.mulf %40, %41 : vector<1x1xf32>
      %c0_27 = arith.constant 0 : index
      %c0_28 = arith.constant 0 : index
      %43 = vector.load %arg5[%c0_27, %c0_28] : memref<1x1xf32, #tpu.memory_space<vmem>>, vector<1x1xf32>
      tpu.vector_store %arg5[%c0_27, %c0_28], %42 {strides = array<i32>} : memref<1x1xf32, #tpu.memory_space<vmem>>, vector<1x1xf32>,
    } else {
    }
    return
  }
  func.func @transform_0(%arg0: i32, %arg1: i32) -> (i32, i32) {
    %c1_i32 = arith.constant 1 : i32
    %0 = arith.muli %arg0, %c1_i32 : i32
    %1 = arith.addi %0, %arg1 : i32
    %c0_i32 = arith.constant 0 : i32
    %2 = arith.minsi %1, %c0_i32 : i32
    %c0_i32_0 = arith.constant 0 : i32
    %c0_i32_1 = arith.constant 0 : i32
    return %2, %c0_i32_0 : i32, i32
  }
  func.func @transform_1(%arg0: i32, %arg1: i32) -> (i32, i32) {
    %c1_i32 = arith.constant 1 : i32
    %0 = arith.muli %arg0, %c1_i32 : i32
    %1 = arith.addi %0, %arg1 : i32
    %c0_i32 = arith.constant 0 : i32
    %2 = arith.minsi %1, %c0_i32 : i32
    %c0_i32_0 = arith.constant 0 : i32
    %c0_i32_1 = arith.constant 0 : i32
    return %2, %c0_i32_0 : i32, i32
  }
  func.func @transform_2(%arg0: i32, %arg1: i32) -> (i32, i32) {
    %c0_i32 = arith.constant 0 : i32
    %c0_i32_0 = arith.constant 0 : i32
    return %arg0, %c0_i32 : i32, i32
  }
  func.func @transform_3(%arg0: i32, %arg1: i32) -> (i32, i32) {
    %c0_i32 = arith.constant 0 : i32
    %c0_i32_0 = arith.constant 0 : i32
    return %arg0, %c0_i32 : i32, i32
  }
}

</mosaic_0001>

<bundles_post_ra>
// kernel: tpu_custom_call.1
= control target key start
LH: loop header
LB: loop body
LE: loop exit
PB: predicated region body
PF: predicated region fallthrough
CT: control target
= control target key end

     0   :  { %9 = vsyncpa [#allocation5], 0  ;;  %s343_s0 = inlined_call_operand.hbm [shape: f32[16,128], index: 0, kind: input, shape index: {}]   ;;  %s344_s1 = inlined_call_operand.hbm [shape: f32[16,128], index: 1, kind: input, shape index: {}]   ;;  %s345_s2 = inlined_call_operand.hbm [shape: f32[1,1], index: 2, kind: output, shape index: {0}]   ;;  %s346_s3 = inlined_call_operand.hbm [shape: f32[1,1], index: 3, kind: output, shape index: {1}]  }
   0x1   :  { %10 = vsyncpa [#allocation8], 0 }
   0x2   :  { %11 = vsyncpa [#allocation6], 0 }
   0x3   :  { %12 = vsyncpa [#allocation11], 0  ;;  %s267_s12 = smov [#allocation4]   ;;  %s171_s16 = scalar_lea.hbm %s343_s0, 256 }
   0x4   :  { %s24_s13 = sshll.u32 %s267_s12, 4  ;;  %p172_p0 = scmp.ne.s32.totalorder %s343_s0, %s171_s16  ;;  %s25_s13 = int_to_ptr.vmem [resolvable:$true] %s24_s13 }
   0x5   :  { %p175_p1 = scmp.lt.u32.totalorder %s171_s16, %s343_s0 }
   0x7   :  { %p177_p2 = pnand %p175_p1, %p172_p0 }
   0x9   :  { %180 = shalt.err (!%p177_p2)
}
   0xa   :  { %s181_s21 = scalar_lea.vmem %s25_s13, 256  ;;  %p186_p4 = scmp.lt.s32.totalorder %s25_s13, %s25_s13 }
   0xb   :  { %p182_p3 = scmp.ne.s32.totalorder %s25_s13, %s181_s21  ;;  %p187_p5 = scmp.lt.s32.totalorder %s181_s21, %s181_s21 }
   0xd   :  { %p188_p6 = por %p187_p5, %p186_p4 }
   0xf   :  { %p189_p7 = pnand %p188_p6, %p182_p3 }
  0x11   :  { %192 = shalt.err (!%p189_p7)
}
  0x12   :  { %s268_s22 = smov 128   ;;  %s269_s23 = smov 8  }
  0x13   :  { %30 = dma.hbm_to_vmem [thread:$0]  %s343_s0, 256, %s25_s13, [#allocation5], %s268_s22, %s268_s22, %s269_s23  }
  0x14   :  { %s270_s26 = smov [#allocation7]   ;;  %s193_s30 = scalar_lea.hbm %s344_s1, 256 }
  0x15   :  { %s42_s27 = sshll.u32 %s270_s26, 4  ;;  %p194_p8 = scmp.ne.s32.totalorder %s344_s1, %s193_s30  ;;  %s43_s27 = int_to_ptr.vmem [resolvable:$true] %s42_s27 }
  0x16   :  { %p197_p9 = scmp.lt.u32.totalorder %s193_s30, %s344_s1 }
  0x18   :  { %p199_p10 = pnand %p197_p9, %p194_p8 }
  0x1a   :  { %202 = shalt.err (!%p199_p10)
}
  0x1b   :  { %s203_s8 = scalar_lea.vmem %s43_s27, 256  ;;  %p208_p12 = scmp.lt.s32.totalorder %s43_s27, %s43_s27 }
  0x1c   :  { %p204_p11 = scmp.ne.s32.totalorder %s43_s27, %s203_s8  ;;  %p209_p13 = scmp.lt.s32.totalorder %s203_s8, %s203_s8 }
  0x1e   :  { %p210_p0 = por %p209_p13, %p208_p12 }
  0x20   :  { %p211_p1 = pnand %p210_p0, %p204_p11 }
  0x22   :  { %214 = shalt.err (!%p211_p1)
}
  0x23   :  { %48 = dma.hbm_to_vmem [thread:$0]  %s344_s1, 256, %s43_s27, [#allocation8], %s268_s22, %s268_s22, %s269_s23  }
  0x24   :  { %259 = dma.done.wait [#allocation5], 256  }
  0x25   :  { %260 = vsyncadd [#allocation5], 4294967040 }
  0x26   :  { %261 = dma.done.wait [#allocation8], 256  }
  0x27   :  { %262 = vsyncadd [#allocation8], 4294967040  ;;  %v69_v0 = vld [vmem:[#allocation4] sm:$0xff]  ;;  %v70_v1 = vld [vmem:[#allocation4 + $0x8] sm:$0xff]  ;;  %s271_s1 = smov [#allocation9]   ;;  %vm108_vm0 = vcmask 0  }
  0x28   :  { %v71_v2 = vld [vmem:[#allocation7] sm:$0xff]  ;;  %v72_v3 = vld [vmem:[#allocation7 + $0x8] sm:$0xff]  ;;  %v77_v5 = vmul.f32 %v69_v0, %v69_v0  ;;  %v78_v7 = vmul.f32 %v70_v1, %v70_v1  ;;  %v159_v8 = vadd.f32 -1.0, %v69_v0  ;;  %v160_v9 = vadd.f32 -1.0, %v70_v1  ;;  %s129_s10 = sshll.u32 %s271_s1, 4  ;;  %s272_s12 = smov [#allocation10]   ;;  %s130_s10 = int_to_ptr.vmem [resolvable:$true] %s129_s10 }
  0x29   :  { %v157_v4 = vadd.f32 -1.0, %v71_v2  ;;  %v158_v6 = vadd.f32 -1.0, %v72_v3  ;;  %s139_s13 = sshll.u32 %s272_s12, 4  ;;  %s215_s15 = scalar_lea.vmem %s130_s10, 16  ;;  %s140_s13 = int_to_ptr.vmem [resolvable:$true] %s139_s13 }
  0x2a   :  { %v87_v14 = vmul.f32 %v159_v8, %v159_v8  ;;  %v88_v15 = vmul.f32 %v160_v9, %v160_v9  ;;  %p216_p2 = scmp.ne.s32.totalorder %s130_s10, %s215_s15  ;;  %s219_s16 = scalar_lea.vmem %s130_s10, 32 }
  0x2b   :  { %v79_v10 = vmul.f32 %v157_v4, %v157_v4  ;;  %v80_v11 = vmul.f32 %v158_v6, %v158_v6  ;;  %p220_p3 = scmp.lt.s32.totalorder %s130_s10, %s130_s10  ;;  %p221_p4 = scmp.lt.s32.totalorder %s219_s16, %s215_s15 }
  0x2c   :  { %v90_v17 = vadd.f32 %v88_v15, %v87_v14 }
  0x2d   :  { %v81_v12 = vadd.f32 %v79_v10, %v77_v5  ;;  %v82_v13 = vadd.f32 %v80_v11, %v78_v7  ;;  %p222_p5 = por %p221_p4, %p220_p3 }
  0x2f   :  { %v84_v16 = vadd.f32 %v82_v13, %v81_v12  ;;  %p223_p6 = pnand %p222_p5, %p216_p2 }
  0x31   :  { %97 = vadd.xlane.f32.xlu0 %v84_v16 }
  0x35   :  { %111 = vadd.xlane.f32.xlu0 %v90_v17 }
  0xbe   :  { %v98_v18 = vpop.xlane.xlu0 %97 }
  0xbf   :  { %v99_v19 = vrot.slane %v98_v18, 4 }
  0xc1   :  { %v100_v20 = vadd.f32 %v99_v19, %v98_v18 }
  0xc2   :  { %v112_v21 = vpop.xlane.xlu0 %111 }
  0xc3   :  { %v101_v22 = vrot.slane %v100_v20, 2  ;;  %v113_v23 = vrot.slane %v112_v21, 4 }
  0xc5   :  { %v114_v24 = vadd.f32 %v113_v23, %v112_v21  ;;  %v102_v25 = vadd.f32 %v101_v22, %v100_v20 }
  0xc7   :  { %v115_v26 = vrot.slane %v114_v24, 2  ;;  %v103_v27 = vrot.slane %v102_v25, 1 }
  0xc9   :  { %v116_v28 = vadd.f32 %v115_v26, %v114_v24  ;;  %v104_v29 = vadd.f32 %v103_v27, %v102_v25 }
  0xcb   :  { %161 = vpush %v104_v29  ;;  %v117_v30 = vrot.slane %v116_v28, 1 }
  0xcd   :  { %v118_v31 = vadd.f32 %v117_v30, %v116_v28 }
  0xcf   :  { %163 = vpush %v118_v31 }
  0xfc   :  { %s162_s11 = spop %161 }
  0xfd   :  { %v106_v32 = vstv %s162_s11 }
  0xfe   :  { %v107_v33 = vmul.f32 0.00024414063, %v106_v32 }
 0x100   :  { %s164_s14 = spop %163  ;;  %109 = vst.msk [vmem:[#allocation9] sm:$0x1] %vm108_vm0, %v107_v33 }
 0x101   :  { %v120_v34 = vstv %s164_s14 }
 0x102   :  { %226 = shalt.err (!%p223_p6)
}
 0x103   :  { %s227_s19 = scalar_lea.hbm %s345_s2, 16 }
 0x104   :  { %p228_p7 = scmp.ne.s32.totalorder %s345_s2, %s227_s19  ;;  %p231_p8 = scmp.lt.u32.totalorder %s227_s19, %s345_s2 }
 0x106   :  { %p233_p9 = pnand %p231_p8, %p228_p7 }
 0x108   :  { %236 = shalt.err (!%p233_p9)
}
 0x109   :  { %132 = dma.vmem_to_hbm [thread:$0]  %s130_s10, 16, %s345_s2, [#allocation6]   ;;  %v121_v35 = vmul.f32 0.00024414063, %v120_v34 }
 0x10a   :  { %s237_s26 = scalar_lea.vmem %s140_s13, 16  ;;  %s241_s27 = scalar_lea.vmem %s140_s13, 32 }
 0x10b   :  { %122 = vst.msk [vmem:[#allocation10] sm:$0x1] %vm108_vm0, %v121_v35  ;;  %p238_p10 = scmp.ne.s32.totalorder %s140_s13, %s237_s26  ;;  %p242_p11 = scmp.lt.s32.totalorder %s140_s13, %s140_s13 }
 0x10c   :  { %p243_p12 = scmp.lt.s32.totalorder %s241_s27, %s237_s26 }
 0x10e   :  { %p244_p13 = por %p243_p12, %p242_p11 }
 0x110   :  { %p245_p0 = pnand %p244_p13, %p238_p10 }
 0x112   :  { %248 = shalt.err (!%p245_p0)
}
 0x113   :  { %s249_s30 = scalar_lea.hbm %s346_s3, 16 }
 0x114   :  { %p250_p1 = scmp.ne.s32.totalorder %s346_s3, %s249_s30  ;;  %p253_p2 = scmp.lt.u32.totalorder %s249_s30, %s346_s3 }
 0x116   :  { %p255_p3 = pnand %p253_p2, %p250_p1 }
 0x118   :  { %258 = shalt.err (!%p255_p3)
}
 0x119   :  { %142 = dma.vmem_to_hbm [thread:$0]  %s140_s13, 16, %s346_s3, [#allocation11]  }
 0x11a   :  { %263 = dma.done.wait [#allocation6], 16  }
 0x11b   :  { %264 = vsyncadd [#allocation6], 4294967280 }
 0x11c   :  { %265 = dma.done.wait [#allocation11], 16  }
 0x11d   :  { %266 = vsyncadd [#allocation11], 4294967280 }
 0x11e   :  { %149 = vsyncpa [#allocation5], 1 }
 0x11f   :  { %150 = vsyncpa [#allocation8], 1 }
 0x120   :  { %151 = vsyncpa [#allocation6], 1 }
 0x121   :  { %152 = vsyncpa [#allocation11], 1 }

</bundles_post_ra>
